<compile_context>
chip_gen: v5e
topology: v5e:2x2
jax: 0.10.0
libtpu: 0.0.40
codegen_flags: <defaults>
</compile_context>

<pallas_src>
import math

import jax
import jax.numpy as jnp
from jax.experimental import pallas as pl
from jax.experimental.pallas import tpu as pltpu


def _ffn_kernel(x_ref, w1_ref, w2_ref, o_ref, acc_ref):
    # x_ref: (tm, Cp), w1_ref: (Cp, th), w2_ref: (th, Cp),
    # o_ref: (tm, Cp), acc_ref: (tm, Cp) f32 scratch.
    h_idx = pl.program_id(1)

    @pl.when(h_idx == 0)
    def _():
        acc_ref[...] = jnp.zeros_like(acc_ref)

    # MXU takes native (bf16/f32) inputs with f32 accumulation — no up-cast.
    h = jnp.dot(x_ref[...], w1_ref[...], preferred_element_type=jnp.float32)
    # Exact erf GELU (nn.GELU() default, approximate='none'); erf runs on the EUP.
    h = 0.5 * h * (1.0 + jax.lax.erf(h * (1.0 / math.sqrt(2.0))))
    acc_ref[...] += jnp.dot(h.astype(w2_ref.dtype), w2_ref[...],
                            preferred_element_type=jnp.float32)

    @pl.when(h_idx == pl.num_programs(1) - 1)
    def _():
        o_ref[...] = acc_ref[...].astype(o_ref.dtype)


def _round_up(a, b):
    return ((a + b - 1) // b) * b


def feed_forward(x, w1, w2, *, tm=256, th=512):
    """x: (B, T, C); w1: (C, 4C); w2: (4C, C). Returns (B, T, C)."""
    B, T, C = x.shape
    H = w1.shape[1]
    assert w1.shape == (C, H) and w2.shape == (H, C)

    M = B * T
    x2 = x.reshape(M, C)

    itemsize = jnp.dtype(x.dtype).itemsize
    # Min sublane granularity for the row tile (8 for 4-byte, 16 for 2-byte dtypes).
    sub = max(8, 32 // itemsize)

    # --- pad lane dims (C, H) to multiples of 128 for aligned, unmasked stores ---
    C_pad = _round_up(C, 128)
    H_pad = _round_up(H, 128)
    if C_pad != C or H_pad != H:
        x2 = jnp.pad(x2, ((0, 0), (0, C_pad - C)))
        w1 = jnp.pad(w1, ((0, C_pad - C), (0, H_pad - H)))
        w2 = jnp.pad(w2, ((0, H_pad - H), (0, C_pad - C)))

    # --- row tile: clamp for tiny M, pad M up to a multiple of it otherwise ---
    tm_eff = min(tm, _round_up(M, sub))
    M_pad = _round_up(M, tm_eff)
    if M_pad != M:
        x2 = jnp.pad(x2, ((0, M_pad - M), (0, 0)))

    # --- hidden tile: largest multiple of 128 (<= th) that divides H_pad ---
    th_eff = min(_round_up(min(th, H_pad), 128), H_pad)
    while H_pad % th_eff != 0:
        th_eff -= 128

    gm = M_pad // tm_eff
    gh = H_pad // th_eff

    # VMEM budget: double-buffered x/W1/W2/out tiles + f32 accumulator + slack,
    # capped below v7x's 64 MiB physical VMEM.
    stream_bytes = 2 * itemsize * (tm_eff * C_pad + C_pad * th_eff
                                   + th_eff * C_pad + tm_eff * C_pad)
    acc_bytes = tm_eff * C_pad * 4
    vmem_limit = min(max(stream_bytes + acc_bytes + (4 << 20), 32 << 20), 48 << 20)

    cost = pl.CostEstimate(
        flops=4 * M_pad * C_pad * H_pad,          # two matmuls, 2*M*C*H flops each
        transcendentals=M_pad * H_pad,            # erf over the hidden intermediate
        bytes_accessed=itemsize * (2 * M_pad * C_pad + 2 * C_pad * H_pad),
    )

    out = pl.pallas_call(
        _ffn_kernel,
        out_shape=jax.ShapeDtypeStruct((M_pad, C_pad), x.dtype),
        grid_spec=pltpu.PrefetchScalarGridSpec(
            num_scalar_prefetch=0,
            grid=(gm, gh),                                          # reduction axis last
            in_specs=[
                pl.BlockSpec((tm_eff, C_pad), lambda i, h: (i, 0)),  # x row tile
                pl.BlockSpec((C_pad, th_eff), lambda i, h: (0, h)),  # W1 hidden chunk
                pl.BlockSpec((th_eff, C_pad), lambda i, h: (h, 0)),  # W2 hidden chunk
            ],
            out_specs=pl.BlockSpec((tm_eff, C_pad), lambda i, h: (i, 0)),
            scratch_shapes=[pltpu.VMEM((tm_eff, C_pad), jnp.float32)],
        ),
        compiler_params=pltpu.CompilerParams(
            dimension_semantics=("parallel", "arbitrary"),
            vmem_limit_bytes=vmem_limit,
        ),
        cost_estimate=cost,
    )(x2, w1, w2)

    if M_pad != M or C_pad != C:
        out = out[:M, :C]
    return out.reshape(B, T, C)


def _init_params(key, n_embd, dtype=jnp.float32):
    # Mirror torch.nn.Linear default init (kaiming uniform: U[-1/sqrt(fan_in), ...]),
    # deterministically from a JAX PRNG key. Stored as (in, out) for the kernel.
    k1, k2 = jax.random.split(key)
    hidden = 4 * n_embd
    b1 = 1.0 / math.sqrt(n_embd)
    b2 = 1.0 / math.sqrt(hidden)
    w1 = jax.random.uniform(k1, (n_embd, hidden), dtype, minval=-b1, maxval=b1)
    w2 = jax.random.uniform(k2, (hidden, n_embd), dtype, minval=-b2, maxval=b2)
    return w1, w2


def _reference(x, w1, w2):
    h = x.astype(jnp.float32) @ w1.astype(jnp.float32)
    h = jax.nn.gelu(h, approximate=False)
    return (h @ w2.astype(jnp.float32)).astype(x.dtype)


if __name__ == "__main__":
    B, T, n_embd = 2, 8, 32
    key = jax.random.PRNGKey(0)
    kx, kp = jax.random.split(key)
    x = jax.random.normal(kx, (B, T, n_embd), dtype=jnp.float32)
    w1, w2 = _init_params(kp, n_embd)

    y = feed_forward(x, w1, w2)
    y = jax.block_until_ready(y)

    y_ref = _reference(x.reshape(-1, n_embd), w1, w2).reshape(B, T, n_embd)
    assert y.shape == (B, T, n_embd)
    assert jnp.allclose(y, y_ref, atol=1e-5, rtol=1e-5), "mismatch vs reference"

    print("KERNEL_OK")
</pallas_src>

<mosaic_0001>
module attributes {stable_mosaic.version = 11 : i64} {
  func.func @_ffn_kernel(%arg0: i32, %arg1: i32, %arg2: memref<16x128xf32, #tpu.memory_space<vmem>>, %arg3: memref<128x128xf32, #tpu.memory_space<vmem>>, %arg4: memref<128x128xf32, #tpu.memory_space<vmem>>, %arg5: memref<16x128xf32, #tpu.memory_space<vmem>>, %arg6: memref<16x128xf32, #tpu.memory_space<vmem>>) attributes {dimension_semantics = [#tpu.dimension_semantics<parallel>, #tpu.dimension_semantics<arbitrary>], iteration_bounds = array<i64: 1, 1>, scalar_prefetch = 0 : i64, scratch_operands = 1 : i64, tpu.core_type = #tpu.core_type<tc>, window_params = [{transform_indices = @transform_0, window_bounds = array<i64: 16, 128>}, {transform_indices = @transform_1, window_bounds = array<i64: 128, 128>}, {transform_indices = @transform_2, window_bounds = array<i64: 128, 128>}, {transform_indices = @transform_3, window_bounds = array<i64: 16, 128>}]} {
    %c0_i32 = arith.constant 0 : i32
    %0 = arith.cmpi eq, %arg1, %c0_i32 : i32
    %1 = arith.extui %0 : i1 to i32
    %c0_i32_0 = arith.constant 0 : i32
    %2 = arith.cmpi ne, %1, %c0_i32_0 : i32
    scf.if %2 {
      %cst_16 = arith.constant 0.000000e+00 : f32
      %22 = vector.broadcast %cst_16 : f32 to vector<16x128xf32>
      %c0_17 = arith.constant 0 : index
      %c0_18 = arith.constant 0 : index
      %23 = vector.load %arg6[%c0_17, %c0_18] : memref<16x128xf32, #tpu.memory_space<vmem>>, vector<16x128xf32>
      tpu.vector_store %arg6[%c0_17, %c0_18], %22 {strides = array<i32>} : memref<16x128xf32, #tpu.memory_space<vmem>>, vector<16x128xf32>,
    } else {
    }
    %c0 = arith.constant 0 : index
    %c0_1 = arith.constant 0 : index
    %3 = vector.load %arg2[%c0, %c0_1] : memref<16x128xf32, #tpu.memory_space<vmem>>, vector<16x128xf32>
    %c0_2 = arith.constant 0 : index
    %c0_3 = arith.constant 0 : index
    %4 = vector.load %arg3[%c0_2, %c0_3] : memref<128x128xf32, #tpu.memory_space<vmem>>, vector<128x128xf32>
    %cst = arith.constant dense<0.000000e+00> : vector<16x128xf32>
    %5 = tpu.matmul %3, %4, %cst {dimension_numbers = #tpu.dot_dimension_numbers<[1], [0], [0], [1], [0, 0, 1, 1], [], []>} : vector<16x128xf32>, vector<128x128xf32>, vector<16x128xf32> -> vector<16x128xf32>
    %cst_4 = arith.constant 5.000000e-01 : f32
    %6 = vector.broadcast %cst_4 : f32 to vector<16x128xf32>
    %7 = arith.mulf %6, %5 : vector<16x128xf32>
    %cst_5 = arith.constant 0.707106769 : f32
    %8 = vector.broadcast %cst_5 : f32 to vector<16x128xf32>
    %9 = arith.mulf %5, %8 : vector<16x128xf32>
    %10 = math.erf %9 : vector<16x128xf32>
    %cst_6 = arith.constant 1.000000e+00 : f32
    %11 = vector.broadcast %cst_6 : f32 to vector<16x128xf32>
    %12 = arith.addf %11, %10 : vector<16x128xf32>
    %13 = arith.mulf %7, %12 : vector<16x128xf32>
    %c0_7 = arith.constant 0 : index
    %c0_8 = arith.constant 0 : index
    %14 = vector.load %arg6[%c0_7, %c0_8] : memref<16x128xf32, #tpu.memory_space<vmem>>, vector<16x128xf32>
    %c0_9 = arith.constant 0 : index
    %c0_10 = arith.constant 0 : index
    %15 = vector.load %arg4[%c0_9, %c0_10] : memref<128x128xf32, #tpu.memory_space<vmem>>, vector<128x128xf32>
    %cst_11 = arith.constant dense<0.000000e+00> : vector<16x128xf32>
    %16 = tpu.matmul %13, %15, %cst_11 {dimension_numbers = #tpu.dot_dimension_numbers<[1], [0], [0], [1], [0, 0, 1, 1], [], []>} : vector<16x128xf32>, vector<128x128xf32>, vector<16x128xf32> -> vector<16x128xf32>
    %17 = arith.addf %14, %16 : vector<16x128xf32>
    %c0_12 = arith.constant 0 : index
    %c0_13 = arith.constant 0 : index
    %18 = vector.load %arg6[%c0_12, %c0_13] : memref<16x128xf32, #tpu.memory_space<vmem>>, vector<16x128xf32>
    tpu.vector_store %arg6[%c0_12, %c0_13], %17 {strides = array<i32>} : memref<16x128xf32, #tpu.memory_space<vmem>>, vector<16x128xf32>,
    %c0_i32_14 = arith.constant 0 : i32
    %19 = arith.cmpi eq, %arg1, %c0_i32_14 : i32
    %20 = arith.extui %19 : i1 to i32
    %c0_i32_15 = arith.constant 0 : i32
    %21 = arith.cmpi ne, %20, %c0_i32_15 : i32
    scf.if %21 {
      %c0_16 = arith.constant 0 : index
      %c0_17 = arith.constant 0 : index
      %22 = vector.load %arg6[%c0_16, %c0_17] : memref<16x128xf32, #tpu.memory_space<vmem>>, vector<16x128xf32>
      %c0_18 = arith.constant 0 : index
      %c0_19 = arith.constant 0 : index
      %23 = vector.load %arg5[%c0_18, %c0_19] : memref<16x128xf32, #tpu.memory_space<vmem>>, vector<16x128xf32>
      tpu.vector_store %arg5[%c0_18, %c0_19], %22 {strides = array<i32>} : memref<16x128xf32, #tpu.memory_space<vmem>>, vector<16x128xf32>,
    } else {
    }
    return
  }
  func.func @transform_0(%arg0: i32, %arg1: i32) -> (i32, i32) {
    %c0_i32 = arith.constant 0 : i32
    %c0_i32_0 = arith.constant 0 : i32
    return %arg0, %c0_i32 : i32, i32
  }
  func.func @transform_1(%arg0: i32, %arg1: i32) -> (i32, i32) {
    %c0_i32 = arith.constant 0 : i32
    %c0_i32_0 = arith.constant 0 : i32
    return %c0_i32, %arg1 : i32, i32
  }
  func.func @transform_2(%arg0: i32, %arg1: i32) -> (i32, i32) {
    %c0_i32 = arith.constant 0 : i32
    %c0_i32_0 = arith.constant 0 : i32
    return %arg1, %c0_i32 : i32, i32
  }
  func.func @transform_3(%arg0: i32, %arg1: i32) -> (i32, i32) {
    %c0_i32 = arith.constant 0 : i32
    %c0_i32_0 = arith.constant 0 : i32
    return %arg0, %c0_i32 : i32, i32
  }
}

</mosaic_0001>

<bundles_post_ra>
// kernel: tpu_custom_call.1
= control target key start
LH: loop header
LB: loop body
LE: loop exit
PB: predicated region body
PF: predicated region fallthrough
CT: control target
= control target key end

     0   :  { %8 = vsyncpa [#allocation4], 0  ;;  %s495_s0 = inlined_call_operand.hbm [shape: f32[16,128], index: 0, kind: input, shape index: {}]   ;;  %s496_s1 = inlined_call_operand.hbm [shape: f32[128,128], index: 1, kind: input, shape index: {}]   ;;  %s497_s2 = inlined_call_operand.hbm [shape: f32[128,128], index: 2, kind: input, shape index: {}]   ;;  %s498_s3 = inlined_call_operand.hbm [shape: f32[16,128], index: 3, kind: output, shape index: {}]  }
   0x1   :  { %9 = vsyncpa [#allocation7], 0 }
   0x2   :  { %10 = vsyncpa [#allocation5], 0  ;;  %s28_s14 = sshll.u32 %s496_s1, 4  ;;  %s415_s15 = smov [#allocation6]   ;;  %s29_s14 = int_to_ptr.hbm [resolvable:$true] %s28_s14 }
   0x3   :  { %s30_s16 = sshll.u32 %s415_s15, 4  ;;  %s15_s19 = sshll.u32 %s495_s0, 4  ;;  %s31_s16 = int_to_ptr.vmem [resolvable:$true] %s30_s16  ;;  %s16_s19 = int_to_ptr.hbm [resolvable:$true] %s15_s19 }
   0x4   :  { %s416_s20 = smov 128   ;;  %s417_s21 = smov 8  }
   0x5   :  { %36 = dma.hbm_to_vmem [thread:$0]  %s29_s14, 2048, %s31_s16, [#allocation7], %s416_s20, %s416_s20, %s417_s21  }
   0x6   :  { %s418_s22 = smov [#allocation3]   ;;  %s41_s1 = sshll.u32 %s497_s2, 4  ;;  %s42_s1 = int_to_ptr.hbm [resolvable:$true] %s41_s1 }
   0x7   :  { %s17_s23 = sshll.u32 %s418_s22, 4  ;;  %s419_s0 = smov [#allocation8]   ;;  %s18_s23 = int_to_ptr.vmem [resolvable:$true] %s17_s23 }
   0x8   :  { %23 = dma.hbm_to_vmem [thread:$0]  %s16_s19, 256, %s18_s23, [#allocation4], %s416_s20, %s416_s20, %s417_s21  }
   0x9   :  { %s43_s26 = sshll.u32 %s419_s0, 4  ;;  %s44_s26 = int_to_ptr.vmem [resolvable:$true] %s43_s26 }
   0xa   :  { %49 = dma.hbm_to_vmem [thread:$0]  %s42_s1, 2048, %s44_s26, [#allocation7], %s416_s20, %s416_s20, %s417_s21  }
   0xb   :  { %409 = dma.done.wait [#allocation4], 256  }
   0xc   :  { %410 = vsyncadd [#allocation4], 4294967040 }
   0xd   :  { %411 = dma.done.wait [#allocation7], 4096  }
   0xe   :  { %412 = vsyncadd [#allocation7], 4294963200  ;;  %v85_v0 = vld [vmem:[#allocation6 + $0x78] sm:$0xff]  ;;  %v84_v1 = vld [vmem:[#allocation6 + $0x70] sm:$0xff]  ;;  %s420_s2 = smov [#allocation9]   ;;  %s255_s30 = sshll.u32 %s498_s3, 4  ;;  %s256_s30 = int_to_ptr.hbm [resolvable:$true] %s255_s30 }
   0xf   :  { %86 = vmatpush.msra.mxu0 %v85_v0  ;;  %271 = vmatpush.msra.mxu2 %v85_v0  ;;  %v83_v2 = vld [vmem:[#allocation6 + $0x68] sm:$0xff]  ;;  %v82_v3 = vld [vmem:[#allocation6 + $0x60] sm:$0xff]  ;;  %v81_v4 = vld [vmem:[#allocation6 + $0x58] sm:$0xff]  ;;  %s253_s27 = sshll.u32 %s420_s2, 4  ;;  %s254_s27 = int_to_ptr.vmem [resolvable:$true] %s253_s27 }
  0x10   :  { %v80_v5 = vld [vmem:[#allocation6 + $0x50] sm:$0xff]  ;;  %v79_v6 = vld [vmem:[#allocation6 + $0x48] sm:$0xff]  ;;  %v78_v7 = vld [vmem:[#allocation6 + $0x40] sm:$0xff] }
  0x11   :  { %87 = vmatpush.msra.mxu0 %v84_v1  ;;  %272 = vmatpush.msra.mxu2 %v84_v1  ;;  %v77_v8 = vld [vmem:[#allocation6 + $0x38] sm:$0xff]  ;;  %v76_v9 = vld [vmem:[#allocation6 + $0x30] sm:$0xff]  ;;  %v75_v10 = vld [vmem:[#allocation6 + $0x28] sm:$0xff] }
  0x12   :  { %v74_v11 = vld [vmem:[#allocation6 + $0x20] sm:$0xff]  ;;  %v73_v12 = vld [vmem:[#allocation6 + $0x18] sm:$0xff]  ;;  %v72_v13 = vld [vmem:[#allocation6 + $0x10] sm:$0xff] }
  0x13   :  { %88 = vmatpush.msra.mxu0 %v83_v2  ;;  %273 = vmatpush.msra.mxu2 %v83_v2  ;;  %v71_v14 = vld [vmem:[#allocation6 + $0x8] sm:$0xff]  ;;  %v70_v15 = vld [vmem:[#allocation6] sm:$0xff]  ;;  %v68_v16 = vld [vmem:[#allocation3] sm:$0xff] }
  0x14   :  { %v69_v17 = vld [vmem:[#allocation3 + $0x8] sm:$0xff]  ;;  %v213_v19 = vld [vmem:[#allocation8 + $0x70] sm:$0xff]  ;;  %v212_v20 = vld [vmem:[#allocation8 + $0x68] sm:$0xff] }
  0x15   :  { %89 = vmatpush.msra.mxu0 %v82_v3  ;;  %274 = vmatpush.msra.mxu2 %v82_v3  ;;  %v214_v18 = vld [vmem:[#allocation8 + $0x78] sm:$0xff]  ;;  %v211_v21 = vld [vmem:[#allocation8 + $0x60] sm:$0xff]  ;;  %v209_v23 = vld [vmem:[#allocation8 + $0x50] sm:$0xff] }
  0x16   :  { %215 = vmatpush.msra.mxu1 %v214_v18  ;;  %287 = vmatpush.msra.mxu3 %v214_v18  ;;  %v210_v22 = vld [vmem:[#allocation8 + $0x58] sm:$0xff]  ;;  %v208_v25 = vld [vmem:[#allocation8 + $0x48] sm:$0xff]  ;;  %v207_v27 = vld [vmem:[#allocation8 + $0x40] sm:$0xff] }
  0x17   :  { %90 = vmatpush.msra.mxu0 %v81_v4  ;;  %275 = vmatpush.msra.mxu2 %v81_v4  ;;  %v206_v28 = vld [vmem:[#allocation8 + $0x38] sm:$0xff]  ;;  %v205_v30 = vld [vmem:[#allocation8 + $0x30] sm:$0xff]  ;;  %v204_v33 = vld [vmem:[#allocation8 + $0x28] sm:$0xff] }
  0x18   :  { %216 = vmatpush.msra.mxu1 %v213_v19  ;;  %288 = vmatpush.msra.mxu3 %v213_v19  ;;  %v203_v36 = vld [vmem:[#allocation8 + $0x20] sm:$0xff]  ;;  %v202_v40 = vld [vmem:[#allocation8 + $0x18] sm:$0xff]  ;;  %v201_v44 = vld [vmem:[#allocation8 + $0x10] sm:$0xff] }
  0x19   :  { %91 = vmatpush.msra.mxu0 %v80_v5  ;;  %276 = vmatpush.msra.mxu2 %v80_v5  ;;  %v200_v49 = vld [vmem:[#allocation8 + $0x8] sm:$0xff]  ;;  %v199_v53 = vld [vmem:[#allocation8] sm:$0xff] }
  0x1a   :  { %217 = vmatpush.msra.mxu1 %v212_v20  ;;  %289 = vmatpush.msra.mxu3 %v212_v20 }
  0x1b   :  { %92 = vmatpush.msra.mxu0 %v79_v6  ;;  %277 = vmatpush.msra.mxu2 %v79_v6 }
  0x1c   :  { %218 = vmatpush.msra.mxu1 %v211_v21  ;;  %290 = vmatpush.msra.mxu3 %v211_v21 }
  0x1d   :  { %93 = vmatpush.msra.mxu0 %v78_v7  ;;  %278 = vmatpush.msra.mxu2 %v78_v7 }
  0x1e   :  { %219 = vmatpush.msra.mxu1 %v210_v22  ;;  %291 = vmatpush.msra.mxu3 %v210_v22 }
  0x1f   :  { %94 = vmatpush.msra.mxu0 %v77_v8  ;;  %279 = vmatpush.msra.mxu2 %v77_v8 }
  0x20   :  { %220 = vmatpush.msra.mxu1 %v209_v23  ;;  %292 = vmatpush.msra.mxu3 %v209_v23 }
  0x21   :  { %95 = vmatpush.msra.mxu0 %v76_v9  ;;  %280 = vmatpush.msra.mxu2 %v76_v9 }
  0x22   :  { %221 = vmatpush.msra.mxu1 %v208_v25  ;;  %293 = vmatpush.msra.mxu3 %v208_v25 }
  0x23   :  { %96 = vmatpush.msra.mxu0 %v75_v10  ;;  %281 = vmatpush.msra.mxu2 %v75_v10 }
  0x24   :  { %222 = vmatpush.msra.mxu1 %v207_v27  ;;  %294 = vmatpush.msra.mxu3 %v207_v27 }
  0x25   :  { %97 = vmatpush.msra.mxu0 %v74_v11  ;;  %282 = vmatpush.msra.mxu2 %v74_v11 }
  0x26   :  { %223 = vmatpush.msra.mxu1 %v206_v28  ;;  %295 = vmatpush.msra.mxu3 %v206_v28 }
  0x27   :  { %98 = vmatpush.msra.mxu0 %v73_v12  ;;  %283 = vmatpush.msra.mxu2 %v73_v12 }
  0x28   :  { %224 = vmatpush.msra.mxu1 %v205_v30  ;;  %296 = vmatpush.msra.mxu3 %v205_v30 }
  0x29   :  { %99 = vmatpush.msra.mxu0 %v72_v13  ;;  %284 = vmatpush.msra.mxu2 %v72_v13 }
  0x2a   :  { %225 = vmatpush.msra.mxu1 %v204_v33  ;;  %297 = vmatpush.msra.mxu3 %v204_v33 }
  0x2b   :  { %100 = vmatpush.msra.mxu0 %v71_v14  ;;  %285 = vmatpush.msra.mxu2 %v71_v14 }
  0x2c   :  { %226 = vmatpush.msra.mxu1 %v203_v36  ;;  %298 = vmatpush.msra.mxu3 %v203_v36 }
  0x2d   :  { %101 = vmatpush.msra.mxu0 %v70_v15  ;;  %286 = vmatpush.msra.mxu2 %v70_v15 }
  0x2e   :  { %102 = vmatmul.f32.vlgmr.msra.gmra.mxu0 %v68_v16  ;;  %105 = vmatmul.f32.vlgmr.msra.gmra.mxu2 %v69_v17 }
  0x2f   :  { %227 = vmatpush.msra.mxu1 %v202_v40  ;;  %299 = vmatpush.msra.mxu3 %v202_v40 }
  0x31   :  { %228 = vmatpush.msra.mxu1 %v201_v44  ;;  %300 = vmatpush.msra.mxu3 %v201_v44 }
  0x33   :  { %229 = vmatpush.msra.mxu1 %v200_v49  ;;  %301 = vmatpush.msra.mxu3 %v200_v49 }
  0x35   :  { %230 = vmatpush.msra.mxu1 %v199_v53  ;;  %302 = vmatpush.msra.mxu3 %v199_v53 }
  0xab   :  { %v459_v24 = vpop.f32.mrf.mxu0 }
  0xac   :  { %v462_v26 = vmul.f32 0.70710677, %v459_v24  ;;  %v109_v44 = vmul.f32 0.5, %v459_v24 }
  0xae   :  { %v113_v29 = vmul.f32 %v462_v26, %v462_v26 }
  0xb0   :  { %v466_v31 = vmin.f32 %v113_v29, 16.0 }
  0xb1   :  { %v468_v32 = vpop.f32.mrf.mxu2 }
  0xb2   :  { %v115_v34 = vmul.f32 2.1237322e-06, %v466_v31  ;;  %v472_v35 = vmul.f32 0.70710677, %v468_v32  ;;  %v126_v37 = vmul.f32 3.8918573e-05, %v466_v31 }
  0xb4   :  { %v116_v38 = vadd.f32 0.00028619796, %v115_v34  ;;  %v153_v39 = vmul.f32 %v472_v35, %v472_v35  ;;  %v127_v41 = vadd.f32 0.001143296, %v126_v37 }
  0xb6   :  { %v117_v42 = vmul.f32 %v116_v38, %v466_v31  ;;  %v154_v43 = vmin.f32 %v153_v39, 16.0  ;;  %v128_v45 = vmul.f32 %v127_v41, %v466_v31 }
  0xb8   :  { %v155_v46 = vmul.f32 2.1237322e-06, %v154_v43  ;;  %v166_v47 = vmul.f32 3.8918573e-05, %v154_v43  ;;  %v118_v48 = vadd.f32 0.0036580483, %v117_v42 }
  0xb9   :  { %v129_v50 = vadd.f32 0.014752088, %v128_v45 }
  0xba   :  { %v156_v51 = vadd.f32 0.00028619796, %v155_v46  ;;  %v167_v52 = vadd.f32 0.001143296, %v166_v47  ;;  %v119_v57 = vmul.f32 %v118_v48, %v466_v31 }
  0xbb   :  { %v130_v54 = vmul.f32 %v129_v50, %v466_v31  ;;  %v110_v50 = vmul.f32 0.5, %v468_v32 }
  0xbc   :  { %v157_v55 = vmul.f32 %v156_v51, %v154_v43  ;;  %v168_v56 = vmul.f32 %v167_v52, %v154_v43  ;;  %v120_v63 = vadd.f32 0.05243302, %v119_v57 }
  0xbd   :  { %v131_v58 = vadd.f32 0.112945676, %v130_v54 }
  0xbe   :  { %v158_v59 = vadd.f32 0.0036580483, %v157_v55  ;;  %v169_v60 = vadd.f32 0.014752088, %v168_v56  ;;  %v121_v5 = vmul.f32 %v120_v63, %v466_v31 }
  0xbf   :  { %v132_v61 = vmul.f32 %v131_v58, %v466_v31 }
  0xc0   :  { %v170_v62 = vmul.f32 %v169_v60, %v154_v43  ;;  %v159_v1 = vmul.f32 %v158_v59, %v154_v43  ;;  %v122_v10 = vadd.f32 0.18741608, %v121_v5 }
  0xc1   :  { %v133_v0 = vadd.f32 0.4994258, %v132_v61 }
  0xc2   :  { %v171_v2 = vadd.f32 0.112945676, %v170_v62  ;;  %v160_v7 = vadd.f32 0.05243302, %v159_v1  ;;  %v123_v14 = vmul.f32 %v122_v10, %v466_v31 }
  0xc3   :  { %v134_v3 = vmul.f32 %v133_v0, %v466_v31 }
  0xc4   :  { %v172_v4 = vmul.f32 %v171_v2, %v154_v43  ;;  %v161_v11 = vmul.f32 %v160_v7, %v154_v43  ;;  %v124_v18 = vadd.f32 1.1283791, %v123_v14 }
  0xc5   :  { %v135_v6 = vadd.f32 1.0, %v134_v3 }
  0xc6   :  { %v173_v8 = vadd.f32 0.4994258, %v172_v4  ;;  %v162_v15 = vadd.f32 0.18741608, %v161_v11  ;;  %v125_v28 = vmul.f32 %v124_v18, %v462_v26 }
  0xc7   :  { %309 = vrcp.f32 %v135_v6  ;;  %v147_v19 = vand.u32 2147483648, %v135_v6  ;;  %v145_v23 = vand.u32 2147483647, %v135_v6  ;;  %vm141_vm1 = vweird.f32 %v135_v6 }
  0xc8   :  { %v174_v9 = vmul.f32 %v173_v8, %v154_v43  ;;  %v163_v21 = vmul.f32 %v162_v15, %v154_v43 }
  0xc9   :  { %v148_v29 = vor.u32 1.1754944e-38, %v147_v19  ;;  %vm146_vm3 = vcmp.eq.f32.partialorder %v145_v23, 8.507059e+37 }
  0xca   :  { %v175_v12 = vadd.f32 1.0, %v174_v9  ;;  %v164_v33 = vadd.f32 1.1283791, %v163_v21 }
  0xcc   :  { %311 = vrcp.f32 %v175_v12  ;;  %v187_v34 = vand.u32 2147483648, %v175_v12  ;;  %v185_v38 = vand.u32 2147483647, %v175_v12  ;;  %vm181_vm5 = vweird.f32 %v175_v12 }
  0xcd   :  { %v310_v13 = vpop.eup %309  ;;  %v165_v43 = vmul.f32 %v164_v33, %v472_v35 }
  0xce   :  { %v137_v16 = vmul.f32 %v310_v13, %v135_v6  ;;  %vm142_vm0 = vweird.f32 %v310_v13  ;;  %v188_v42 = vor.u32 1.1754944e-38, %v187_v34  ;;  %vm186_vm7 = vcmp.eq.f32.partialorder %v185_v38, 8.507059e+37 }
  0xcf   :  { %vm143_vm2 = vmor %vm141_vm1, %vm142_vm0 }
  0xd0   :  { %v138_v17 = vsub.f32 1.0, %v137_v16 }
  0xd2   :  { %v312_v20 = vpop.eup %311  ;;  %v139_v22 = vmul.f32 %v310_v13, %v138_v17 }
  0xd3   :  { %v177_v25 = vmul.f32 %v312_v20, %v175_v12  ;;  %vm182_vm4 = vweird.f32 %v312_v20 }
  0xd4   :  { %v140_v27 = vadd.f32 %v310_v13, %v139_v22  ;;  %vm183_vm6 = vmor %vm181_vm5, %vm182_vm4 }
  0xd5   :  { %v178_v30 = vsub.f32 1.0, %v177_v25 }
  0xd6   :  { %v144_v31 = vsel %vm143_vm2, %v310_v13, %v140_v27 }
  0xd7   :  { %v149_v36 = vsel %vm146_vm3, %v148_v29, %v144_v31  ;;  %v179_v37 = vmul.f32 %v312_v20, %v178_v30 }
  0xd8   :  { %v150_v39 = vmul.f32 %v149_v36, %v125_v28 }
  0xd9   :  { %v180_v40 = vadd.f32 %v312_v20, %v179_v37 }
  0xda   :  { %v269_v41 = vclamps-f32 %v150_v39, 1.0 }
  0xdb   :  { %v184_v26 = vsel %vm183_vm6, %v312_v20, %v180_v40 }
  0xdc   :  { %v193_v45 = vadd.f32 1.0, %v269_v41  ;;  %v189_v46 = vsel %vm186_vm7, %v188_v42, %v184_v26 }
  0xdd   :  { %v190_v47 = vmul.f32 %v189_v46, %v165_v43 }
  0xde   :  { %v195_v48 = vmul.f32 %v193_v45, %v109_v44 }
  0xdf   :  { %v270_v49 = vclamps-f32 %v190_v47, 1.0 }
  0xe0   :  { %231 = vmatmul.f32.vlgmr.msra.gmra.mxu1 %v195_v48 }
  0xe1   :  { %v194_v51 = vadd.f32 1.0, %v270_v49 }
  0xe3   :  { %v196_v52 = vmul.f32 %v194_v51, %v110_v50 }
  0xe5   :  { %234 = vmatmul.f32.vlgmr.msra.gmra.mxu3 %v196_v52 }
 0x15d   :  { %v232_v53 = vpop.f32.mrf.mxu1 }
 0x15e   :  { %247 = vst [vmem:[#allocation9] sm:$0xff] %v232_v53 }
 0x168   :  { %v235_v24 = vpop.f32.mrf.mxu3 }
 0x169   :  { %248 = vst [vmem:[#allocation9 + $0x8] sm:$0xff] %v235_v24 }
 0x16a   :  { %261 = dma.vmem_to_hbm [thread:$0]  %s254_s27, 256, %s256_s30, [#allocation5], %s416_s20, %s416_s20, %s417_s21  }
 0x16b   :  { %413 = dma.done.wait [#allocation5], 256  }
 0x16c   :  { %414 = vsyncadd [#allocation5], 4294967040 }
 0x16d   :  { %266 = vsyncpa [#allocation4], 1 }
 0x16e   :  { %267 = vsyncpa [#allocation7], 1 }
 0x16f   :  { %268 = vsyncpa [#allocation5], 1 }

</bundles_post_ra>
